<compile_context>
chip_gen: v6e
topology: v6e:2x2x1
jax: 0.10.0
libtpu: 0.0.40
codegen_flags: <defaults>
</compile_context>

<pallas_src>
import functools

import jax
import jax.numpy as jnp
from jax import lax
from jax.experimental import pallas as pl
from jax.experimental.pallas import tpu as pltpu

HIDDEN = 128


def _critic_kernel(x_ref, w1_ref, b1_ref, w2_ref, b2_ref, w3_ref, b3_ref, out_ref):
    x = x_ref[...]                                                    # (bb, S)
    h1 = jnp.dot(x, w1_ref[...], preferred_element_type=jnp.float32) + b1_ref[...]
    h1 = jnp.maximum(h1, 0.0)                                         # (bb, 128)
    h2 = jnp.dot(h1, w2_ref[...], preferred_element_type=jnp.float32) + b2_ref[...]
    h2 = jnp.maximum(h2, 0.0)                                         # (bb, 128)
    # Final layer: contract the (1, HIDDEN) w3 row with h2's feature axis so the result
    # is (1, bb) with batch on the lane axis -> lane-dense output store.
    v = lax.dot_general(
        w3_ref[...], h2,
        dimension_numbers=(((1,), (1,)), ((), ())),
        preferred_element_type=jnp.float32,
    )
    out_ref[...] = (v + b3_ref[0]).astype(out_ref.dtype)


def _round_up(x, m):
    return (x + m - 1) // m * m


@functools.partial(jax.jit, static_argnames=("block_b",))
def critic_forward(state, params, block_b=256):
    """Pallas TPU forward pass of the Critic MLP.

    state:  (B, state_dim) float32
    params: w1 (S,128), b1 (1,128), w2 (128,128), b2 (1,128), w3 (1,128), b3 (1,)
    returns (B, 1) float32
    """
    B, S = state.shape
    w1, b1, w2, b2, w3, b3 = (params[k] for k in ("w1", "b1", "w2", "b2", "w3", "b3"))

    # Pick the batch tile: whole (sublane-padded) batch if small, else block_b rows.
    B8 = _round_up(B, 8)
    if B8 <= block_b:
        bb = B8
    else:
        assert block_b % 128 == 0, "block_b must be a multiple of 128 for multi-block grids"
        bb = block_b
    B_pad = _round_up(B, bb)
    if B_pad != B:
        state = jnp.pad(state, ((0, B_pad - B), (0, 0)))

    grid = (B_pad // bb,)
    full = lambda i: (0, 0)  # weights/biases: same full block every grid step

    out = pl.pallas_call(
        _critic_kernel,
        out_shape=jax.ShapeDtypeStruct((1, B_pad), jnp.float32),
        grid_spec=pltpu.PrefetchScalarGridSpec(
            num_scalar_prefetch=0,
            grid=grid,
            in_specs=[
                pl.BlockSpec((bb, S), lambda i: (i, 0)),               # state tile
                pl.BlockSpec((S, HIDDEN), full),                       # w1
                pl.BlockSpec((1, HIDDEN), full),                       # b1
                pl.BlockSpec((HIDDEN, HIDDEN), full),                  # w2
                pl.BlockSpec((1, HIDDEN), full),                       # b2
                pl.BlockSpec((1, HIDDEN), full),                       # w3 (row)
                pl.BlockSpec(memory_space=pltpu.MemorySpace.SMEM),     # b3 scalar
            ],
            out_specs=pl.BlockSpec((1, bb), lambda i: (0, i)),         # lane-dense slab
        ),
        compiler_params=pltpu.CompilerParams(
            dimension_semantics=("parallel",),
        ),
    )(state, w1, b1, w2, b2, w3, b3)

    return out.reshape(B_pad, 1)[:B]


def init_params(state_dim, key):
    """Deterministic init matching init_weights: W ~ N(0, 0.1), b = 0.1."""
    k1, k2, k3 = jax.random.split(key, 3)
    # PyTorch Linear weight is (out, in); sample in that shape, transpose to (in, out)
    # for layers 1/2 so the kernel can do x @ W.  w3 stays in PyTorch layout (1, 128).
    w1 = (0.1 * jax.random.normal(k1, (HIDDEN, state_dim), jnp.float32)).T
    w2 = (0.1 * jax.random.normal(k2, (HIDDEN, HIDDEN), jnp.float32)).T
    w3 = 0.1 * jax.random.normal(k3, (1, HIDDEN), jnp.float32)
    b1 = jnp.full((1, HIDDEN), 0.1, jnp.float32)
    b2 = jnp.full((1, HIDDEN), 0.1, jnp.float32)
    b3 = jnp.full((1,), 0.1, jnp.float32)
    return {"w1": w1, "b1": b1, "w2": w2, "b2": b2, "w3": w3, "b3": b3}


def critic_reference(state, params):
    """Pure-JAX reference for correctness check."""
    hi = jax.lax.Precision.HIGHEST
    h1 = jnp.maximum(jnp.dot(state, params["w1"], precision=hi) + params["b1"], 0.0)
    h2 = jnp.maximum(jnp.dot(h1, params["w2"], precision=hi) + params["b2"], 0.0)
    return jnp.dot(h2, params["w3"].T, precision=hi) + params["b3"]


if __name__ == "__main__":
    key = jax.random.PRNGKey(0)
    k_state, k_params, k_state2 = jax.random.split(key, 3)

    batch, state_dim = 8, 32
    params = init_params(state_dim, k_params)

    # Small case: single grid step, whole batch in one tile.
    state = jax.random.normal(k_state, (batch, state_dim), jnp.float32)
    value = jax.block_until_ready(critic_forward(state, params))
    ref = critic_reference(state, params)
    assert value.shape == (batch, 1)
    assert jnp.allclose(value, ref, atol=1e-4, rtol=1e-4), "mismatch vs reference (small)"

    # Larger, non-multiple batch: exercises padding + multi-block grid (bb=256).
    batch2 = 260
    state2 = jax.random.normal(k_state2, (batch2, state_dim), jnp.float32)
    value2 = jax.block_until_ready(critic_forward(state2, params))
    ref2 = critic_reference(state2, params)
    assert value2.shape == (batch2, 1)
    assert jnp.allclose(value2, ref2, atol=1e-4, rtol=1e-4), "mismatch vs reference (padded)"

    print("KERNEL_OK")
</pallas_src>

<mosaic_0001>
module attributes {stable_mosaic.version = 11 : i64} {
  func.func @_critic_kernel(%arg0: i32, %arg1: memref<8x32xf32, #tpu.memory_space<vmem>>, %arg2: memref<32x128xf32, #tpu.memory_space<vmem>>, %arg3: memref<1x128xf32, #tpu.memory_space<vmem>>, %arg4: memref<128x128xf32, #tpu.memory_space<vmem>>, %arg5: memref<1x128xf32, #tpu.memory_space<vmem>>, %arg6: memref<1x128xf32, #tpu.memory_space<vmem>>, %arg7: memref<1xf32, #tpu.memory_space<smem>>, %arg8: memref<1x8xf32, #tpu.memory_space<vmem>>) attributes {dimension_semantics = [#tpu.dimension_semantics<parallel>], iteration_bounds = array<i64: 1>, scalar_prefetch = 0 : i64, scratch_operands = 0 : i64, tpu.core_type = #tpu.core_type<tc>, window_params = [{transform_indices = @transform_0, window_bounds = array<i64: 8, 32>}, {pipeline_mode = #tpu.pipeline_mode<synchronous>, transform_indices = @transform_1, window_bounds = array<i64: 32, 128>}, {pipeline_mode = #tpu.pipeline_mode<synchronous>, transform_indices = @transform_2, window_bounds = array<i64: 1, 128>}, {pipeline_mode = #tpu.pipeline_mode<synchronous>, transform_indices = @transform_3, window_bounds = array<i64: 128, 128>}, {pipeline_mode = #tpu.pipeline_mode<synchronous>, transform_indices = @transform_4, window_bounds = array<i64: 1, 128>}, {pipeline_mode = #tpu.pipeline_mode<synchronous>, transform_indices = @transform_5, window_bounds = array<i64: 1, 128>}, {transform_indices = @transform_6, window_bounds = array<i64: 1>}, {transform_indices = @transform_7, window_bounds = array<i64: 1, 8>}]} {
    %c0 = arith.constant 0 : index
    %c0_0 = arith.constant 0 : index
    %0 = vector.load %arg1[%c0, %c0_0] : memref<8x32xf32, #tpu.memory_space<vmem>>, vector<8x32xf32>
    %c0_1 = arith.constant 0 : index
    %c0_2 = arith.constant 0 : index
    %1 = vector.load %arg2[%c0_1, %c0_2] : memref<32x128xf32, #tpu.memory_space<vmem>>, vector<32x128xf32>
    %cst = arith.constant dense<0.000000e+00> : vector<8x128xf32>
    %2 = tpu.matmul %0, %1, %cst {dimension_numbers = #tpu.dot_dimension_numbers<[1], [0], [0], [1], [0, 0, 1, 1], [], []>} : vector<8x32xf32>, vector<32x128xf32>, vector<8x128xf32> -> vector<8x128xf32>
    %c0_3 = arith.constant 0 : index
    %c0_4 = arith.constant 0 : index
    %3 = vector.load %arg3[%c0_3, %c0_4] : memref<1x128xf32, #tpu.memory_space<vmem>>, vector<1x128xf32>
    %4 = vector.broadcast %3 : vector<1x128xf32> to vector<8x128xf32>
    %5 = arith.addf %2, %4 : vector<8x128xf32>
    %cst_5 = arith.constant 0.000000e+00 : f32
    %6 = vector.broadcast %cst_5 : f32 to vector<8x128xf32>
    %7 = arith.maximumf %5, %6 : vector<8x128xf32>
    %c0_6 = arith.constant 0 : index
    %c0_7 = arith.constant 0 : index
    %8 = vector.load %arg4[%c0_6, %c0_7] : memref<128x128xf32, #tpu.memory_space<vmem>>, vector<128x128xf32>
    %cst_8 = arith.constant dense<0.000000e+00> : vector<8x128xf32>
    %9 = tpu.matmul %7, %8, %cst_8 {dimension_numbers = #tpu.dot_dimension_numbers<[1], [0], [0], [1], [0, 0, 1, 1], [], []>} : vector<8x128xf32>, vector<128x128xf32>, vector<8x128xf32> -> vector<8x128xf32>
    %c0_9 = arith.constant 0 : index
    %c0_10 = arith.constant 0 : index
    %10 = vector.load %arg5[%c0_9, %c0_10] : memref<1x128xf32, #tpu.memory_space<vmem>>, vector<1x128xf32>
    %11 = vector.broadcast %10 : vector<1x128xf32> to vector<8x128xf32>
    %12 = arith.addf %9, %11 : vector<8x128xf32>
    %cst_11 = arith.constant 0.000000e+00 : f32
    %13 = vector.broadcast %cst_11 : f32 to vector<8x128xf32>
    %14 = arith.maximumf %12, %13 : vector<8x128xf32>
    %c0_12 = arith.constant 0 : index
    %c0_13 = arith.constant 0 : index
    %15 = vector.load %arg6[%c0_12, %c0_13] : memref<1x128xf32, #tpu.memory_space<vmem>>, vector<1x128xf32>
    %cst_14 = arith.constant dense<0.000000e+00> : vector<1x8xf32>
    %16 = tpu.matmul %15, %14, %cst_14 {dimension_numbers = #tpu.dot_dimension_numbers<[1], [1], [0], [0], [0, 0, 1, 0], [], []>} : vector<1x128xf32>, vector<8x128xf32>, vector<1x8xf32> -> vector<1x8xf32>
    %c0_15 = arith.constant 0 : index
    %17 = memref.load %arg7[%c0_15] : memref<1xf32, #tpu.memory_space<smem>>
    %18 = vector.broadcast %17 : f32 to vector<1x8xf32>
    %19 = arith.addf %16, %18 : vector<1x8xf32>
    %c0_16 = arith.constant 0 : index
    %c0_17 = arith.constant 0 : index
    %20 = vector.load %arg8[%c0_16, %c0_17] : memref<1x8xf32, #tpu.memory_space<vmem>>, vector<1x8xf32>
    tpu.vector_store %arg8[%c0_16, %c0_17], %19 {strides = array<i32>} : memref<1x8xf32, #tpu.memory_space<vmem>>, vector<1x8xf32>,
    return
  }
  func.func @transform_0(%arg0: i32) -> (i32, i32) {
    %c0_i32 = arith.constant 0 : i32
    %c0_i32_0 = arith.constant 0 : i32
    return %arg0, %c0_i32 : i32, i32
  }
  func.func @transform_1(%arg0: i32) -> (i32, i32) {
    %c0_i32 = arith.constant 0 : i32
    %c0_i32_0 = arith.constant 0 : i32
    %c0_i32_1 = arith.constant 0 : i32
    return %c0_i32, %c0_i32_0 : i32, i32
  }
  func.func @transform_2(%arg0: i32) -> (i32, i32) {
    %c0_i32 = arith.constant 0 : i32
    %c0_i32_0 = arith.constant 0 : i32
    %c0_i32_1 = arith.constant 0 : i32
    return %c0_i32, %c0_i32_0 : i32, i32
  }
  func.func @transform_3(%arg0: i32) -> (i32, i32) {
    %c0_i32 = arith.constant 0 : i32
    %c0_i32_0 = arith.constant 0 : i32
    %c0_i32_1 = arith.constant 0 : i32
    return %c0_i32, %c0_i32_0 : i32, i32
  }
  func.func @transform_4(%arg0: i32) -> (i32, i32) {
    %c0_i32 = arith.constant 0 : i32
    %c0_i32_0 = arith.constant 0 : i32
    %c0_i32_1 = arith.constant 0 : i32
    return %c0_i32, %c0_i32_0 : i32, i32
  }
  func.func @transform_5(%arg0: i32) -> (i32, i32) {
    %c0_i32 = arith.constant 0 : i32
    %c0_i32_0 = arith.constant 0 : i32
    %c0_i32_1 = arith.constant 0 : i32
    return %c0_i32, %c0_i32_0 : i32, i32
  }
  func.func @transform_6(%arg0: i32) -> i32 {
    %c0_i32 = arith.constant 0 : i32
    %c0_i32_0 = arith.constant 0 : i32
    return %c0_i32 : i32
  }
  func.func @transform_7(%arg0: i32) -> (i32, i32) {
    %c0_i32 = arith.constant 0 : i32
    %c0_i32_0 = arith.constant 0 : i32
    return %c0_i32, %arg0 : i32, i32
  }
}

</mosaic_0001>

<bundles_post_ra>
// kernel: critic_forward.1
= control target key start
LH: loop header
LB: loop body
LE: loop exit
PB: predicated region body
PF: predicated region fallthrough
CT: control target
= control target key end

     0   :  { %13 = vsyncpa [#allocation4], 0  ;;  %s610_s0 = inlined_call_operand.hbm [shape: f32[8,32], index: 0, kind: input, shape index: {}]   ;;  %s611_s1 = inlined_call_operand.hbm [shape: f32[32,128], index: 1, kind: input, shape index: {}]   ;;  %s612_s2 = inlined_call_operand.vmem [shape: f32[1,128], index: 2, kind: input, shape index: {}]   ;;  %s613_s3 = inlined_call_operand.hbm [shape: f32[128,128], index: 3, kind: input, shape index: {}]   ;;  %s614_s4 = inlined_call_operand.vmem [shape: f32[1,128], index: 4, kind: input, shape index: {}]   ;;  %s615_s5 = inlined_call_operand.vmem [shape: f32[1,128], index: 5, kind: input, shape index: {}]   ;;  %s616_s6 = inlined_call_operand.<no memory space> [shape: f32[1], index: 6, kind: input, shape index: {}]   ;;  %s617_s7 = inlined_call_operand.hbm [shape: f32[1,8], index: 7, kind: output, shape index: {}]  }
   0x1   :  { %14 = vsyncpa [#allocation7], 0 }
   0x2   :  { %15 = vsyncpa [#allocation5], 0  ;;  %s511_s24 = smov [#allocation6]  }
   0x3   :  { %s31_s25 = sshll.u32 %s511_s24, 4  ;;  %s32_s25 = int_to_ptr.vmem [resolvable:$true] %s31_s25 }
   0x4   :  { %s433_s26 = scalar_lea.vmem %s32_s25, 512  ;;  %p438_p1 = scmp.lt.s32.totalorder %s32_s25, %s32_s25 }
   0x5   :  { %p434_p0 = scmp.ne.s32.totalorder %s32_s25, %s433_s26  ;;  %p439_p2 = scmp.lt.s32.totalorder %s433_s26, %s433_s26 }
   0x7   :  { %p440_p3 = por %p439_p2, %p438_p1 }
   0x9   :  { %p441_p4 = pnand %p440_p3, %p434_p0 }
   0xb   :  { %444 = shalt.err (!%p441_p4)
}
   0xc   :  { %s512_s27 = smov 128   ;;  %s513_s28 = smov 8  }
   0xd   :  { %37 = dma.hbm_to_vmem [thread:$0]  %s611_s1, 512, %s32_s25, [#allocation7], %s512_s27, %s512_s27, %s513_s28  }
   0xe   :  { %s514_s8 = smov [#allocation3]   ;;  %s515_s10 = smov [#allocation8]  }
   0xf   :  { %s22_s9 = sshll.u32 %s514_s8, 4  ;;  %s45_s11 = sshll.u32 %s515_s10, 4  ;;  %s23_s9 = int_to_ptr.vmem [resolvable:$true] %s22_s9  ;;  %s46_s11 = int_to_ptr.vmem [resolvable:$true] %s45_s11 }
  0x10   :  { %s453_s12 = scalar_lea.vmem %s23_s9, 128  ;;  %p458_p6 = scmp.lt.s32.totalorder %s23_s9, %s23_s9 }
  0x11   :  { %p454_p5 = scmp.ne.s32.totalorder %s23_s9, %s453_s12  ;;  %p459_p7 = scmp.lt.s32.totalorder %s453_s12, %s453_s12 }
  0x13   :  { %p460_p8 = por %p459_p7, %p458_p6 }
  0x15   :  { %p461_p9 = pnand %p460_p8, %p454_p5 }
  0x17   :  { %464 = shalt.err (!%p461_p9)
}
  0x18   :  { %25 = dma.hbm_to_vmem [thread:$0]  %s610_s0, 128, %s23_s9, [#allocation4]  }
  0x19   :  { %s473_s15 = scalar_lea.vmem %s46_s11, 2048  ;;  %p478_p11 = scmp.lt.s32.totalorder %s46_s11, %s46_s11 }
  0x1a   :  { %p474_p10 = scmp.ne.s32.totalorder %s46_s11, %s473_s15  ;;  %p479_p12 = scmp.lt.s32.totalorder %s473_s15, %s473_s15 }
  0x1c   :  { %p480_p13 = por %p479_p12, %p478_p11 }
  0x1e   :  { %p481_p0 = pnand %p480_p13, %p474_p10 }
  0x20   :  { %484 = shalt.err (!%p481_p0)
}
  0x21   :  { %51 = dma.hbm_to_vmem [thread:$0]  %s613_s3, 2048, %s46_s11, [#allocation7], %s512_s27, %s512_s27, %s513_s28  }
  0x22   :  { %505 = dma.done.wait [#allocation4], 128  }
  0x23   :  { %506 = vsyncadd [#allocation4], 4294967168 }
  0x24   :  { %507 = dma.done.wait [#allocation7], 2560  }
  0x25   :  { %508 = vsyncadd [#allocation7], 4294964736  ;;  %v516_v0 = vmov 0.0   ;;  %vm517_vm0 = vmmov 0   ;;  %v71_v1 = vld [vmem:[#allocation6 + $0x18] sm:$0xff]  ;;  %v70_v2 = vld [vmem:[#allocation6 + $0x10] sm:$0xff]  ;;  %v250_v33 = vstv %s616_s6 }
  0x26   :  { %366 = vmatprep.subr.mxu0 %v516_v0  ;;  %374 = vmatprep.mubr.msk.f32.mxu0 %vm517_vm0, %v516_v0  ;;  %v169_v3 = vld [vmem:[#allocation8 + $0x78] sm:$0xff]  ;;  %v69_v4 = vld [vmem:[#allocation6 + $0x8] sm:$0xff]  ;;  %v168_v5 = vld [vmem:[#allocation8 + $0x70] sm:$0xff]  ;;  %vm79_vm1 = vcmask 261120   ;;  %s518_s22 = smov [#allocation9]   ;;  %vm321_vm2 = vcmask 57344  }
  0x27   :  { %377 = vmatprep.subr.mxu1 %v516_v0  ;;  %409 = vmatprep.mubr.msk.f32.mxu1 %vm517_vm0, %v516_v0  ;;  %v167_v6 = vld [vmem:[#allocation8 + $0x68] sm:$0xff]  ;;  %v68_v7 = vld [vmem:[#allocation6] sm:$0xff]  ;;  %v67_v8 = vld [vmem:[#allocation3] sm:$0xff]  ;;  %s329_s23 = sshll.u32 %s518_s22, 4  ;;  %s330_s23 = int_to_ptr.vmem [resolvable:$true] %s329_s23 }
  0x28   :  { %367 = vmatpush3.msra.mxu0 %v71_v1  ;;  %378 = vmatpush3.msra.mxu1 %v169_v3  ;;  %v166_v9 = vld [vmem:[#allocation8 + $0x60] sm:$0xff]  ;;  %v165_v10 = vld [vmem:[#allocation8 + $0x58] sm:$0xff]  ;;  %v164_v11 = vld [vmem:[#allocation8 + $0x50] sm:$0xff]  ;;  %s489_s24 = scalar_lea.vmem %s330_s23, 32  ;;  %p490_p2 = scmp.lt.s32.totalorder %s330_s23, %s330_s23 }
  0x29   :  { %368 = vmatprep.subr.mxu0 %v516_v0  ;;  %379 = vmatprep.subr.mxu1 %v516_v0  ;;  %v163_v12 = vld [vmem:[#allocation8 + $0x48] sm:$0xff]  ;;  %v162_v13 = vld [vmem:[#allocation8 + $0x40] sm:$0xff]  ;;  %v161_v14 = vld [vmem:[#allocation8 + $0x38] sm:$0xff] }
  0x2a   :  { %369 = vmatpush3.msra.mxu0 %v70_v2  ;;  %380 = vmatpush3.msra.mxu1 %v168_v5  ;;  %v160_v15 = vld [vmem:[#allocation8 + $0x30] sm:$0xff]  ;;  %v159_v16 = vld [vmem:[#allocation8 + $0x28] sm:$0xff]  ;;  %v158_v17 = vld [vmem:[#allocation8 + $0x20] sm:$0xff] }
  0x2b   :  { %370 = vmatprep.subr.mxu0 %v516_v0  ;;  %381 = vmatprep.subr.mxu1 %v516_v0  ;;  %v157_v18 = vld [vmem:[#allocation8 + $0x18] sm:$0xff]  ;;  %v156_v19 = vld [vmem:[#allocation8 + $0x10] sm:$0xff]  ;;  %v155_v20 = vld [vmem:[#allocation8 + $0x8] sm:$0xff] }
  0x2c   :  { %371 = vmatpush3.msra.mxu0 %v69_v4  ;;  %382 = vmatpush3.msra.mxu1 %v167_v6  ;;  %v154_v21 = vld [vmem:[#allocation8] sm:$0xff]  ;;  %v339_v22 = vld [vmem:[%s612_s2] ss:$0 sm:$0xff] }
  0x2d   :  { %372 = vmatprep.subr.mxu0 %v516_v0  ;;  %383 = vmatprep.subr.mxu1 %v516_v0  ;;  %v341_v27 = vld [vmem:[%s614_s4] ss:$0 sm:$0xff]  ;;  %s485_s4 = scalar_lea.vmem %s330_s23, 16 }
  0x2e   :  { %373 = vmatpush3.msra.mxu0 %v68_v7  ;;  %384 = vmatpush3.msra.mxu1 %v166_v9  ;;  %v248_v32 = vld [vmem:[%s615_s5] sm:$0x1]  ;;  %p486_p1 = scmp.ne.s32.totalorder %s330_s23, %s485_s4  ;;  %p491_p3 = scmp.lt.s32.totalorder %s489_s24, %s485_s4 }
  0x2f   :  { %375 = vmatmul.mubr.msk.f32.vlgmr.msra.gmra.mxu0 %vm79_vm1, %v67_v8  ;;  %385 = vmatprep.subr.mxu1 %v516_v0 }
  0x30   :  { %412 = vmatprep.subr.mxu0 %v516_v0  ;;  %386 = vmatpush3.msra.mxu1 %v165_v10  ;;  %p492_p4 = por %p491_p3, %p490_p2 }
  0x31   :  { %414 = vmatprep.mubr.msk.f32.mxu0 %vm517_vm0, %v516_v0  ;;  %387 = vmatprep.subr.mxu1 %v516_v0 }
  0x32   :  { %388 = vmatpush3.msra.mxu1 %v164_v11  ;;  %p493_p5 = pnand %p492_p4, %p486_p1 }
  0x33   :  { %389 = vmatprep.subr.mxu1 %v516_v0 }
  0x34   :  { %390 = vmatpush3.msra.mxu1 %v163_v12 }
  0x35   :  { %391 = vmatprep.subr.mxu1 %v516_v0 }
  0x36   :  { %392 = vmatpush3.msra.mxu1 %v162_v13 }
  0x37   :  { %393 = vmatprep.subr.mxu1 %v516_v0 }
  0x38   :  { %394 = vmatpush3.msra.mxu1 %v161_v14 }
  0x39   :  { %395 = vmatprep.subr.mxu1 %v516_v0 }
  0x3a   :  { %396 = vmatpush3.msra.mxu1 %v160_v15 }
  0x3b   :  { %397 = vmatprep.subr.mxu1 %v516_v0 }
  0x3c   :  { %398 = vmatpush3.msra.mxu1 %v159_v16 }
  0x3d   :  { %399 = vmatprep.subr.mxu1 %v516_v0 }
  0x3e   :  { %400 = vmatpush3.msra.mxu1 %v158_v17 }
  0x3f   :  { %401 = vmatprep.subr.mxu1 %v516_v0 }
  0x40   :  { %402 = vmatpush3.msra.mxu1 %v157_v18 }
  0x41   :  { %403 = vmatprep.subr.mxu1 %v516_v0 }
  0x42   :  { %404 = vmatpush3.msra.mxu1 %v156_v19 }
  0x43   :  { %405 = vmatprep.subr.mxu1 %v516_v0 }
  0x44   :  { %406 = vmatpush3.msra.mxu1 %v155_v20 }
  0x45   :  { %407 = vmatprep.subr.mxu1 %v516_v0 }
  0x46   :  { %408 = vmatpush3.msra.mxu1 %v154_v21 }
  0xef   :  { %v149_v23 = vpop.f32.mrf.mxu0 }
  0xf0   :  { %v150_v24 = vadd.f32 %v339_v22, %v149_v23 }
  0xf1   :  { %v376_v25 = vpop.f32.mrf.mxu0 }
  0xf2   :  { %v153_v26 = vmax.f32 %v150_v24, 0.0 }
  0xf4   :  { %410 = vmatmul.mubr.f32.vlgmr.msra.gmra.mxu1 %v153_v26 }
 0x1b4   :  { %v243_v28 = vpop.f32.mrf.mxu1 }
 0x1b5   :  { %v244_v29 = vadd.f32 %v341_v27, %v243_v28 }
 0x1b6   :  { %v411_v30 = vpop.f32.mrf.mxu1 }
 0x1b7   :  { %v247_v31 = vmax.f32 %v244_v29, 0.0 }
 0x1b9   :  { %413 = vmatpush3.xpose.msra.mxu0 %v247_v31 }
 0x1bc   :  { %415 = vmatmul.mubr.f32.vlgmr.msra.gmra.mxu0 %v248_v32 }
 0x27c   :  { %v317_v34 = vpop.f32.mrf.mxu0 }
 0x27d   :  { %v318_v35 = vadd.f32 %v317_v34, %v250_v33 }
 0x27e   :  { %v416_v36 = vpop.f32.mrf.mxu0 }
 0x27f   :  { %322 = vst.msk [vmem:[#allocation9] sm:$0x1] %vm321_vm2, %v318_v35 }
 0x280   :  { %496 = shalt.err (!%p493_p5)
}
 0x281   :  { %332 = dma.vmem_to_hbm [thread:$0]  %s330_s23, 16, %s617_s7, [#allocation5]  }
 0x282   :  { %509 = dma.done.wait [#allocation5], 16  }
 0x283   :  { %510 = vsyncadd [#allocation5], 4294967280 }
 0x284   :  { %336 = vsyncpa [#allocation4], 1 }
 0x285   :  { %337 = vsyncpa [#allocation7], 1 }
 0x286   :  { %338 = vsyncpa [#allocation5], 1 }

</bundles_post_ra>
